<compile_context>
chip_gen: v7x
topology: tpu7x:2x2x1
jax: 0.10.0
libtpu: 0.0.40
codegen_flags: <defaults>
</compile_context>

<pallas_src>
import math
from functools import partial

import jax
import jax.numpy as jnp
from jax.experimental import pallas as pl
from jax.experimental.pallas import tpu as pltpu


def _pair(v):
    return (v, v) if isinstance(v, int) else tuple(v)


def _ceil_div(a, b):
    return -(-a // b)


def _preferred_tn():
    # v6e / v7x MXUs are 256 wide; v4 / v5 are 128 wide.
    kind = jax.devices()[0].device_kind.lower()
    return 128 if ("v4" in kind or "v5" in kind) else 256


# ----------------------------- Pallas kernel -----------------------------

def _conv_tap_kernel(p_ref, w_ref, b_ref, o_ref, *, kh, kw, sh, sw, Wq, relu):
    """Fused conv + bias + ReLU for one image and one Cout tile.

    p_ref: (sh*sw, 1, Hq*Wq, C)  bf16 -- phase-split, zero-padded input plane
                                         (resident across the Cout tiles).
    w_ref: (kh*kw, C, tn)        bf16 -- BN-folded weights.
    b_ref: (1, tn)               f32  -- BN-folded bias.
    o_ref: (1, Ho*Wq, tn)        bf16 -- output rows over the full Wq width
                                         (halo columns cropped by the caller).
    """
    m = o_ref.shape[1]
    tn = o_ref.shape[2]
    acc = jnp.zeros((m, tn), jnp.float32)
    # Static, fully unrolled tap loop: each tap is a contiguous shifted window
    # of the resident plane -> a plain 2D bf16 MXU matmul with f32 accumulate.
    for dy in range(kh):
        for dx in range(kw):
            phase = (dy % sh) * sw + (dx % sw)
            off = (dy // sh) * Wq + (dx // sw)
            a = p_ref[phase, 0, off:off + m, :]            # (m, C) bf16
            wk = w_ref[dy * kw + dx]                       # (C, tn) bf16
            acc = acc + jnp.dot(a, wk, preferred_element_type=jnp.float32)
    y = acc + b_ref[...]
    if relu:
        y = jnp.maximum(y, 0.0)
    o_ref[0] = y.astype(o_ref.dtype)


# ----------------------------- conv wrapper -----------------------------

@partial(jax.jit, static_argnames=("ksize", "stride", "padding", "relu"))
def conv_bn_relu(x, w, b, *, ksize, stride, padding, relu=True):
    """x: (N,H,W,C) bf16; w: (kh*kw, C, Cout) bf16 (BN folded); b: (1, Cout) f32."""
    N, H, W, C = x.shape
    kh, kw = ksize
    sh, sw = stride
    ph, pw = padding
    Cout = w.shape[-1]
    Ho = (H + 2 * ph - kh) // sh + 1
    Wo = (W + 2 * pw - kw) // sw + 1

    oy_max = (kh - 1) // sh
    ox_max = (kw - 1) // sw
    # Per-phase plane size: large enough to hold every tap's shifted Ho x Wq
    # window (one spare row when kw > 1 so flat windows never run off the end)
    # and to cover the whole padded input so the phase split is rectangular.
    Hq = max(Ho + oy_max + (1 if ox_max > 0 else 0), _ceil_div(H + 2 * ph, sh))
    Wq = max(Wo + ox_max, _ceil_div(W + 2 * pw, sw))

    xp = jnp.pad(x, ((0, 0),
                     (ph, Hq * sh - H - ph),
                     (pw, Wq * sw - W - pw),
                     (0, 0)))
    # Stride phase split -> (sh*sw, N, Hq*Wq, C); a pure reshape when stride=1.
    P = (xp.reshape(N, Hq, sh, Wq, sw, C)
           .transpose(2, 4, 0, 1, 3, 5)
           .reshape(sh * sw, N, Hq * Wq, C))

    pref = _preferred_tn()
    if Cout % pref == 0:
        tn = pref
    elif Cout % 128 == 0:
        tn = 128
    else:
        tn = Cout                     # full-dim block (allowed for last dim)
    m = Ho * Wq

    kernel = partial(_conv_tap_kernel, kh=kh, kw=kw, sh=sh, sw=sw, Wq=Wq,
                     relu=relu)
    out = pl.pallas_call(
        kernel,
        out_shape=jax.ShapeDtypeStruct((N, m, Cout), jnp.bfloat16),
        grid_spec=pltpu.PrefetchScalarGridSpec(
            num_scalar_prefetch=0,
            grid=(N, Cout // tn),
            in_specs=[
                # Whole phase-split image; block index constant across the
                # Cout axis -> fetched from HBM once per image.
                pl.BlockSpec((sh * sw, 1, Hq * Wq, C), lambda n, j: (0, n, 0, 0)),
                pl.BlockSpec((kh * kw, C, tn), lambda n, j: (0, 0, j)),
                pl.BlockSpec((1, tn), lambda n, j: (0, j)),
            ],
            out_specs=pl.BlockSpec((1, m, tn), lambda n, j: (n, 0, j)),
        ),
        # Per-step VMEM (plane + weight tile + output tile) is far below the
        # 32 MiB scoped default (and v7x's 64 MiB), so no vmem_limit override.
        compiler_params=pltpu.CompilerParams(
            dimension_semantics=("parallel", "parallel")),
    )(P, w, b)

    out = out.reshape(N, Ho, Wq, Cout)
    if Wq != Wo:
        out = out[:, :, :Wo, :]       # crop the halo ("junk") columns
    return out


# ----------------------------- parameters -----------------------------

def make_conv_seq_branch(key, in_channels, out_channels_list, kernel_size_list,
                         strides_list, padding_list):
    assert len(out_channels_list) == len(kernel_size_list)
    assert len(out_channels_list) == len(strides_list)
    assert len(out_channels_list) == len(padding_list)
    params = []
    cin = in_channels
    for cout, k, s, p in zip(out_channels_list, kernel_size_list,
                             strides_list, padding_list):
        kh, kw = _pair(k)
        key, sub = jax.random.split(key)
        fan_in = cin * kh * kw
        bound = 1.0 / math.sqrt(fan_in)          # PyTorch Conv2d default init
        w = jax.random.uniform(sub, (kh, kw, cin, cout), jnp.float32,
                               -bound, bound)
        # TODO(synk): BatchNorm is folded in inference mode with PyTorch-default
        # running stats (mean=0, var=1, gamma=1, beta=0); train-mode batch
        # statistics are not reproduced.
        bn_scale = 1.0 / math.sqrt(1.0 + 1e-3)
        bn_bias = jnp.zeros((1, cout), jnp.float32)
        w_folded = (w * bn_scale).reshape(kh * kw, cin, cout).astype(jnp.bfloat16)
        params.append(dict(w=w_folded, b=bn_bias, ksize=(kh, kw),
                           stride=_pair(s), pad=_pair(p)))
        cin = cout
    return params


def conv_seq_branch_forward(params, x_nchw):
    x = jnp.transpose(x_nchw, (0, 2, 3, 1)).astype(jnp.bfloat16)  # NCHW -> NHWC
    for p in params:
        x = conv_bn_relu(x, p["w"], p["b"], ksize=p["ksize"],
                         stride=p["stride"], padding=p["pad"], relu=True)
    return jnp.transpose(x, (0, 3, 1, 2)).astype(jnp.float32)      # -> NCHW


# ----------------------------- reference (pure JAX) -----------------------------

def _reference_forward(params, x_nchw):
    x = jnp.transpose(x_nchw, (0, 2, 3, 1)).astype(jnp.float32)
    for p in params:
        kh, kw = p["ksize"]
        sh, sw = p["stride"]
        ph, pw = p["pad"]
        cout = p["w"].shape[-1]
        w = p["w"].astype(jnp.float32).reshape(kh, kw, -1, cout)
        x = jax.lax.conv_general_dilated(
            x, w, window_strides=(sh, sw), padding=((ph, ph), (pw, pw)),
            dimension_numbers=("NHWC", "HWIO", "NHWC"))
        x = jnp.maximum(x + p["b"].reshape(1, 1, 1, cout), 0.0)
    return jnp.transpose(x, (0, 3, 1, 2))


if __name__ == "__main__":
    key = jax.random.PRNGKey(0)

    # Small ConvSeqBranch echoing InceptionResNetV2 branch shapes:
    # 1x1, 1x7, 7x1 (stride 1, asymmetric padding) then a 3x3 stride-2 conv.
    in_channels = 16
    out_channels_list = (16, 24, 24, 32)
    kernel_size_list = (1, (1, 7), (7, 1), 3)
    strides_list = (1, 1, 1, 2)
    padding_list = (0, (0, 3), (3, 0), 0)

    pkey, xkey = jax.random.split(key)
    params = make_conv_seq_branch(pkey, in_channels, out_channels_list,
                                  kernel_size_list, strides_list, padding_list)
    x = jax.random.normal(xkey, (2, in_channels, 16, 16), jnp.float32)  # NCHW

    y = jax.block_until_ready(conv_seq_branch_forward(params, x))
    assert y.shape == (2, 32, 7, 7), y.shape
    assert bool(jnp.all(jnp.isfinite(y)))

    # Numerical check against a pure-JAX reference (bf16 MXU path -> loose tol).
    y_ref = jax.block_until_ready(_reference_forward(params, x))
    err = float(jnp.max(jnp.abs(y - y_ref)) / (jnp.max(jnp.abs(y_ref)) + 1e-6))
    assert err < 0.1, f"mismatch vs reference: rel-max err {err}"

    print("KERNEL_OK")
</pallas_src>

<mosaic_0001>
module attributes {stable_mosaic.version = 11 : i64} {
  func.func @_conv_tap_kernel(%arg0: i32, %arg1: i32, %arg2: memref<1x1x256x16xbf16, #tpu.memory_space<vmem>>, %arg3: memref<1x16x16xbf16, #tpu.memory_space<vmem>>, %arg4: memref<1x16xf32, #tpu.memory_space<vmem>>, %arg5: memref<1x256x16xbf16, #tpu.memory_space<vmem>>) attributes {dimension_semantics = [#tpu.dimension_semantics<parallel>, #tpu.dimension_semantics<parallel>], iteration_bounds = array<i64: 2, 1>, scalar_prefetch = 0 : i64, scratch_operands = 0 : i64, tpu.core_type = #tpu.core_type<tc>, window_params = [{transform_indices = @transform_0, window_bounds = array<i64: 1, 1, 256, 16>}, {transform_indices = @transform_1, window_bounds = array<i64: 1, 16, 16>}, {transform_indices = @transform_2, window_bounds = array<i64: 1, 16>}, {transform_indices = @transform_3, window_bounds = array<i64: 1, 256, 16>}]} {
    %cst = arith.constant 0.000000e+00 : f32
    %0 = vector.broadcast %cst : f32 to vector<256x16xf32>
    %c0 = arith.constant 0 : index
    %c0_0 = arith.constant 0 : index
    %c0_1 = arith.constant 0 : index
    %c0_2 = arith.constant 0 : index
    %1 = vector.load %arg2[%c0, %c0_0, %c0_1, %c0_2] : memref<1x1x256x16xbf16, #tpu.memory_space<vmem>>, vector<1x1x256x16xbf16>
    %2 = vector.shape_cast %1 : vector<1x1x256x16xbf16> to vector<256x16xbf16>
    %c0_3 = arith.constant 0 : index
    %c0_4 = arith.constant 0 : index
    %c0_5 = arith.constant 0 : index
    %3 = vector.load %arg3[%c0_3, %c0_4, %c0_5] : memref<1x16x16xbf16, #tpu.memory_space<vmem>>, vector<1x16x16xbf16>
    %4 = vector.shape_cast %3 : vector<1x16x16xbf16> to vector<16x16xbf16>
    %cst_6 = arith.constant dense<0.000000e+00> : vector<256x16xf32>
    %5 = tpu.matmul %2, %4, %cst_6 {dimension_numbers = #tpu.dot_dimension_numbers<[1], [0], [0], [1], [0, 0, 1, 1], [], []>} : vector<256x16xbf16>, vector<16x16xbf16>, vector<256x16xf32> -> vector<256x16xf32>
    %6 = arith.addf %0, %5 : vector<256x16xf32>
    %c0_7 = arith.constant 0 : index
    %c0_8 = arith.constant 0 : index
    %7 = vector.load %arg4[%c0_7, %c0_8] : memref<1x16xf32, #tpu.memory_space<vmem>>, vector<1x16xf32>
    %8 = vector.broadcast %7 : vector<1x16xf32> to vector<256x16xf32>
    %9 = arith.addf %6, %8 : vector<256x16xf32>
    %cst_9 = arith.constant 0.000000e+00 : f32
    %10 = vector.broadcast %cst_9 : f32 to vector<256x16xf32>
    %11 = arith.maximumf %9, %10 : vector<256x16xf32>
    %12 = arith.truncf %11 : vector<256x16xf32> to vector<256x16xbf16>
    %c0_10 = arith.constant 0 : index
    %c0_11 = arith.constant 0 : index
    %c0_12 = arith.constant 0 : index
    %13 = vector.load %arg5[%c0_10, %c0_11, %c0_12] : memref<1x256x16xbf16, #tpu.memory_space<vmem>>, vector<1x256x16xbf16>
    %14 = vector.shape_cast %13 : vector<1x256x16xbf16> to vector<256x16xbf16>
    %15 = vector.shape_cast %12 : vector<256x16xbf16> to vector<1x256x16xbf16>
    tpu.vector_store %arg5[%c0_10, %c0_11, %c0_12], %15 {strides = array<i32>} : memref<1x256x16xbf16, #tpu.memory_space<vmem>>, vector<1x256x16xbf16>,
    return
  }
  func.func @transform_0(%arg0: i32, %arg1: i32) -> (i32, i32, i32, i32) {
    %c0_i32 = arith.constant 0 : i32
    %c0_i32_0 = arith.constant 0 : i32
    %c0_i32_1 = arith.constant 0 : i32
    %c0_i32_2 = arith.constant 0 : i32
    return %c0_i32, %arg0, %c0_i32_0, %c0_i32_1 : i32, i32, i32, i32
  }
  func.func @transform_1(%arg0: i32, %arg1: i32) -> (i32, i32, i32) {
    %c0_i32 = arith.constant 0 : i32
    %c0_i32_0 = arith.constant 0 : i32
    %c0_i32_1 = arith.constant 0 : i32
    return %c0_i32, %c0_i32_0, %arg1 : i32, i32, i32
  }
  func.func @transform_2(%arg0: i32, %arg1: i32) -> (i32, i32) {
    %c0_i32 = arith.constant 0 : i32
    %c0_i32_0 = arith.constant 0 : i32
    return %c0_i32, %arg1 : i32, i32
  }
  func.func @transform_3(%arg0: i32, %arg1: i32) -> (i32, i32, i32) {
    %c0_i32 = arith.constant 0 : i32
    %c0_i32_0 = arith.constant 0 : i32
    return %arg0, %c0_i32, %arg1 : i32, i32, i32
  }
}

</mosaic_0001>

<bundles_post_ra>
// kernel: conv_bn_relu.1
= control target key start
LH: loop header
LB: loop body
LE: loop exit
PB: predicated region body
PF: predicated region fallthrough
CT: control target
= control target key end

     0   :  { %8 = vsyncpa [#allocation3], 0  ;;  %s1697_s0 = inlined_call_operand.hbm [shape: bf16[1,2,256,16], index: 0, kind: input, shape index: {}]   ;;  %s1698_s1 = inlined_call_operand.hbm [shape: bf16[1,16,16], index: 1, kind: input, shape index: {}]   ;;  %s1699_s2 = inlined_call_operand.vmem [shape: f32[1,16], index: 2, kind: input, shape index: {}]   ;;  %s1700_s3 = inlined_call_operand.hbm [shape: bf16[2,256,16], index: 3, kind: output, shape index: {}]  }
   0x1   :  { %10 = vsyncpa [#allocation3 + $0x1], 0 }
   0x2   :  { %11 = vsyncpa [#allocation6], 0 }
   0x3   :  { %12 = vsyncpa [#allocation4], 0 }
   0x4   :  { %14 = vsyncpa [#allocation4 + $0x1], 0  ;;  %s1330_s12 = smov 0   ;;  %s1332_s13 = smov 0  }
   0x5   :  { %s1334_s14 = smov 0   ;;  %s1336_s15 = smov 0  }
   0x6   :  { %s1338_s16 = smov 0   ;;  %s1340_s17 = smov 0  }
   0x7 LB: > { %s892_s18 = sadd.s32 4294967295, %s1301_s17   ;;  %s893_s19 = sadd.s32 4294967294, %s1301_s17   ;;  %s1301_s17 = sphi %s1340_s17, %s20_s17   ;;  %s1297_s16 = sphi %s1338_s16, %s1724_s16   ;;  %s1293_s15 = sphi %s1336_s15, %s1723_s15   ;;  %s1289_s14 = sphi %s1334_s14, %s1722_s14   ;;  %s1285_s13 = sphi %s1332_s13, %s1721_s13   ;;  %s1281_s12 = sphi %s1330_s12, %s1720_s12  }
   0x8   : > { %p52_p0 = scmp.ne.s32.totalorder %s1285_s13, %s1281_s12  ;;  %p1364_p1 = scmp.eq.s32.totalorder %s892_s18, 0 }
   0x9   : > { %p1368_p2 = scmp.eq.s32.totalorder %s892_s18, 1  ;;  %p136_p3 = scmp.eq.s32.totalorder %s893_s19, 1 }
   0xa   : > { %s1705_s20 = scalar_select %p1364_p1, 1, 0 }
   0xb   : > { %s1706_s21 = scalar_select %p1368_p2, 1, 0 }
   0xc   : > { %p1374_p4 = por %p1364_p1, %p52_p0  ;;  %p894_p5 = scmp.ge.s32.totalorder %s1301_s17, 1 }
   0xd   : > { %p1379_p6 = por %p136_p3, %p52_p0  ;;  %p143_p7 = scmp.lt.s32.totalorder %s1301_s17, 3 }
   0xe   : > { %s1707_s22 = scalar_select %p1374_p4, 1, 0 }
   0xf   : > { %s1708_s23 = scalar_select %p1379_p6, 1, 0 }
  0x10   : > { %p1384_p8 = pnand %p894_p5, %p143_p7  ;;  %s1303_s25 = smov [#allocation5]  }
  0x11   : > { %s157_s26 = sshll.u32 %s1303_s25, 4  ;;  %s32_s28 = sadd.s32 1, %s1297_s16  ;;  %s158_s26 = int_to_ptr.vmem [resolvable:$true] %s157_s26 }
  0x12   : > { %s1709_s24 = scalar_select %p1384_p8, 1, 0 }
  0x13   : > { %p1071_p9 = pneg %p1384_p8  ;;  %s1157_s4 = scalar_lea.hbm %s1698_s1, 128 }
  0x14   : > { %p1158_p12 = scmp.ne.s32.totalorder %s1698_s1, %s1157_s4  ;;  %p1164_p5 = scmp.lt.u32.totalorder %s1157_s4, %s1698_s1 }
  0x15   : > { %p1393_p11 = pnand %p1071_p9, %p1364_p1 }
  0x17   : > { %p1159_p13 = pneg %p1393_p11 }
  0x19   : > { %p1160_p0 = pnand %p1159_p13, %p1158_p12 }
  0x1b   : > { %p1161_p3 = pneg %p1160_p0 }
  0x1d   : > { %p1166_p7 = pnand %p1164_p5, %p1161_p3 }
  0x1f   : > { %1169 = shalt.err (!%p1166_p7)
}
  0x20   : > { %s1170_s9 = scalar_lea.vmem %s158_s26, 128  ;;  %p1178_p1 = scmp.lt.s32.totalorder %s158_s26, %s158_s26 }
  0x21   : > { %p1171_p9 = scmp.ne.s32.totalorder %s158_s26, %s1170_s9  ;;  %p1179_p4 = scmp.lt.s32.totalorder %s1170_s9, %s1170_s9 }
  0x23   : > { %p1173_p10 = pnand %p1171_p9, %p1159_p13  ;;  %p1180_p8 = por %p1179_p4, %p1178_p1 }
  0x25   : > { %p1174_p6 = pneg %p1173_p10 }
  0x27   : > { %p1181_p2 = pnand %p1180_p8, %p1174_p6 }
  0x29   : > { %1184 = shalt.err (!%p1181_p2)
}
  0x2a   : > { %s1304_s10 = smov 64   ;;  %s1305_s11 = smov 4  }
  0x2b   : > { %1074 = dma.hbm_to_vmem [thread:$0]  (!%p1393_p11), %s1698_s1, 128, %s158_s26, [#allocation6], %s1304_s10, %s1304_s10, %s1305_s11  }
  0x2c   : > { %p34_p1 = scmp.ge.s32.totalorder %s32_s28, 2  ;;  %s39_s25 = sadd.s32 1, %s1289_s14 }
  0x2d   : > { %p46_p2 = scmp.ne.s32.totalorder %s1289_s14, %s1285_s13  ;;  %p47_p4 = scmp.eq.s32.totalorder %s1301_s17, 0 }
  0x2e   : > { %s1726_s28 = smov (%p34_p1, %s32_s28), 0  ;;  %p1712_p8 = scmp.ne.s32.totalorder %s1706_s21, 0 }
  0x2f   : > { %p1423_p6 = por %p47_p4, %p46_p2  ;;  %s36_s30 = ssub.s32 %s1297_s16, %s1726_s28 }
  0x30   : > { %p1429_p10 = por %p1712_p8, %p46_p2  ;;  %p1084_p12 = scmp.lt.s32.totalorder %s1301_s17, 2 }
  0x31   : > { %p37_p11 = scmp.eq.s32.totalorder %s36_s30, 0  ;;  %s177_s26 = sand.u32 1, %s1289_s14  }
  0x32   : > { %s898_s4 = sshll.u32 %s177_s26, 7  ;;  %s976_s6 = sshll.u32 %s1297_s16, 11 }
  0x33   : > { %s1438_s5 = scalar_select %p37_p11, %s1289_s14, %s39_s25  }
  0x34   : > { %s1444_s9 = scalar_lea.hbm %s1697_s0, %s976_s6  ;;  %s181_s21 = scalar_lea.vmem [#allocation2], %s898_s4 }
  0x35   : > { %s188_s18 = sshll.u32 %s181_s21, 4  ;;  %p1450_p13 = pnand %p1084_p12, %p1423_p6  ;;  %s1446_s18 = int_to_ptr.vmem [resolvable:$true] %s188_s18 }
  0x36   : > { %s1454_s25 = scalar_lea.sflag [#allocation3], %s177_s26  ;;  %s1185_s30 = scalar_lea.hbm %s1444_s9, 2048 }
  0x37   : > { %p1186_p0 = scmp.ne.s32.totalorder %s1444_s9, %s1185_s30  ;;  %p1187_p3 = pneg %p1450_p13 }
  0x38   : > { %s1190_s29 = scalar_lea.hbm %s1697_s0, 4096  ;;  %p1191_p9 = scmp.lt.u32.totalorder %s1444_s9, %s1697_s0 }
  0x39   : > { %p1188_p5 = pnand %p1187_p3, %p1186_p0  ;;  %p1192_p1 = scmp.lt.u32.totalorder %s1190_s29, %s1185_s30 }
  0x3a   : > { %p1194_p4 = scmp.lt.u32.totalorder %s1185_s30, %s1444_s9 }
  0x3b   : > { %p1189_p7 = pneg %p1188_p5  ;;  %p1193_p2 = por %p1192_p1, %p1191_p9 }
  0x3d   : > { %p1195_p6 = por %p1194_p4, %p1193_p2 }
  0x3f   : > { %p1196_p8 = pnand %p1195_p6, %p1189_p7 }
  0x41   : > { %1199 = shalt.err (!%p1196_p8)
}
  0x42   : > { %s1200_s26 = scalar_lea.vmem %s1446_s18, 2048  ;;  %s1306_s21 = smov [#allocation2]  }
  0x43   : > { %p1201_p12 = scmp.ne.s32.totalorder %s1446_s18, %s1200_s26  ;;  %s1205_s4 = sshll.u32 %s1306_s21, 4  ;;  %s1206_s4 = int_to_ptr.vmem [resolvable:$false] %s1205_s4 }
  0x44   : > { %s1207_s6 = scalar_lea.vmem %s1206_s4, 4096  ;;  %p1208_p5 = scmp.lt.s32.totalorder %s1446_s18, %s1206_s4 }
  0x45   : > { %p1203_p11 = pnand %p1201_p12, %p1187_p3  ;;  %p1209_p9 = scmp.lt.s32.totalorder %s1207_s6, %s1200_s26 }
  0x47   : > { %p1204_p0 = pneg %p1203_p11  ;;  %p1210_p1 = por %p1209_p9, %p1208_p5 }
  0x49   : > { %p1211_p2 = pnand %p1210_p1, %p1204_p0 }
  0x4b   : > { %1214 = shalt.err (!%p1211_p2)
}
  0x4c   : > { %1078 = dma.hbm_to_vmem [thread:$0]  (!%p1450_p13), %s1444_s9, 2048, %s1446_s18, %s1454_s25, %s1304_s10, %s1304_s10, %s1305_s11  }
  0x4d   : > { %p1715_p3 = scmp.ne.s32.totalorder %s1709_s24, 0 }
  0x4e   : > { %s1488_s30 = sand.u32 (!%p1715_p3), 1, %s1285_s13   ;;  %p1716_p7 = scmp.ne.s32.totalorder (!%p1715_p3), %s1707_s22, 0 }
  0x4f   : > { %200 = sbr.rel (%p1715_p3) target bundleno = 355 (0x163), region = 32  ;;  %s902_s29 = sshll.u32 (!%p1715_p3), %s1488_s30, 7 }
  0x50   : > { %s203_s7 = scalar_lea.sflag (!%p1715_p3), [#allocation3], %s1488_s30  ;;  %s1494_s19 = scalar_lea.vmem (!%p1715_p3), [#allocation2], %s902_s29 }
  0x56   : > { %1268 = dma.done.wait (%p1716_p7), %s203_s7, 2048  }
  0x57   : > { %1270 = vsyncadd (%p1716_p7), %s203_s7, 4294965248  ;;  %p1717_p13 = scmp.ne.s32.totalorder %s1705_s20, 0 }
  0x59   : > { %1272 = dma.done.wait (%p1717_p13), [#allocation6], 128  }
  0x5a   : > { %1274 = vsyncadd (%p1717_p13), [#allocation6], 4294967168  ;;  %v1140_v0 = vld [vmem:[#allocation5] sm:$0xff]   ;;  %vm367_vm0 = vcmask 130048   ;;  %v1143_v3 = vld [vmem:[%s1494_s19 + $0x8] sm:$0xff]   ;;  %vm737_vm1 = vcmask 125952  }
  0x5b   : > { %v1141_v1 = vld [vmem:[%s1494_s19] sm:$0xff]   ;;  %1027 = vmatprep.subr.bf16.mxu0 %v1140_v0  ;;  %1061 = vmatprep.subr.bf16.mxu1 %v1140_v0  ;;  %v1144_v4 = vld [vmem:[%s1494_s19 + $0x48] sm:$0xff]   ;;  %v1145_v5 = vld [vmem:[%s1494_s19 + $0x10] sm:$0xff]   ;;  %s1551_s24 = scalar_lea.vmem [#allocation7], %s902_s29  ;;  %s1009_s10 = sshll.u32 %s1293_s15, 11 }
  0x5c   : > { %v1142_v2 = vld [vmem:[%s1494_s19 + $0x40] sm:$0xff]   ;;  %1028 = vmatpush3.bf16.msra.mxu0 %v1140_v0  ;;  %1062 = vmatpush3.bf16.msra.mxu1 %v1140_v0  ;;  %v1146_v6 = vld [vmem:[%s1494_s19 + $0x50] sm:$0xff]   ;;  %v1147_v7 = vld [vmem:[%s1494_s19 + $0x18] sm:$0xff]   ;;  %s785_s11 = sshll.u32 %s1551_s24, 4  ;;  %s1634_s18 = scalar_lea.hbm %s1700_s3, %s1009_s10  ;;  %s1636_s11 = int_to_ptr.vmem [resolvable:$true] %s785_s11 }
  0x5d   : > { %1029 = vmatprep.mubr.msk.bf16.mxu0 %vm367_vm0, %v1141_v1  ;;  %1045 = vmatprep.mubr.msk.bf16.mxu1 %vm367_vm0, %v1142_v2  ;;  %v1148_v8 = vld [vmem:[%s1494_s19 + $0x58] sm:$0xff]   ;;  %v1149_v9 = vld [vmem:[%s1494_s19 + $0x20] sm:$0xff]   ;;  %v1151_v11 = vld [vmem:[%s1494_s19 + $0x28] sm:$0xff]   ;;  %s771_s25 = scalar_lea.sflag [#allocation4], %s1488_s30  ;;  %s1215_s8 = scalar_lea.vmem %s1636_s11, 2048 }
  0x5e   : > { %v1150_v10 = vld [vmem:[%s1494_s19 + $0x60] sm:$0xff]   ;;  %v1152_v12 = vld [vmem:[%s1494_s19 + $0x68] sm:$0xff]   ;;  %v1153_v13 = vld [vmem:[%s1494_s19 + $0x30] sm:$0xff]   ;;  %p1216_p4 = scmp.ne.s32.totalorder %s1636_s11, %s1215_s8  ;;  %s1307_s26 = smov [#allocation7]  }
  0x5f   : > { %1030 = vmatmul.mubr.msk.bf16.vlgmr.msra.gmra.mrb[0].mxu0 %vm367_vm0, %v1143_v3  ;;  %1046 = vmatmul.mubr.msk.bf16.vlgmr.msra.gmra.mrb[0].mxu1 %vm367_vm0, %v1144_v4  ;;  %v1154_v14 = vld [vmem:[%s1494_s19 + $0x70] sm:$0xff]   ;;  %v1155_v15 = vld [vmem:[%s1494_s19 + $0x38] sm:$0xff]   ;;  %v1539_v17 = vld [vmem:[%s1699_s2] ss:$0 sm:$0xff]  ;;  %s1219_s21 = sshll.u32 %s1307_s26, 4  ;;  %s1220_s21 = int_to_ptr.vmem [resolvable:$false] %s1219_s21 }
  0x60   : > { %1033 = vmatprep.mubr.msk.bf16.mxu0 %vm367_vm0, %v1145_v5  ;;  %1049 = vmatprep.mubr.msk.bf16.mxu1 %vm367_vm0, %v1146_v6  ;;  %v1156_v16 = vld [vmem:[%s1494_s19 + $0x78] sm:$0xff]   ;;  %p1217_p6 = pnand %p1216_p4, %p1429_p10  ;;  %s1221_s4 = scalar_lea.vmem %s1220_s21, 4096 }
  0x61   : > { %p1222_p12 = scmp.lt.s32.totalorder %s1636_s11, %s1220_s21  ;;  %p1223_p11 = scmp.lt.s32.totalorder %s1221_s4, %s1215_s8 }
  0x62   : > { %p1218_p8 = pneg %p1217_p6 }
  0x63   : > { %p1224_p0 = por %p1223_p11, %p1222_p12 }
  0x65   : > { %p1225_p5 = pnand %p1224_p0, %p1218_p8 }
  0x67   : > { %1034 = vmatmul.mubr.msk.bf16.gmra.mrb[4].mxu0 %vm367_vm0, %v1147_v7  ;;  %1050 = vmatmul.mubr.msk.bf16.gmra.mrb[4].mxu1 %vm367_vm0, %v1148_v8 }
  0x68   : > { %1037 = vmatprep.mubr.msk.bf16.mxu0 %vm367_vm0, %v1149_v9  ;;  %1053 = vmatprep.mubr.msk.bf16.mxu1 %vm367_vm0, %v1150_v10 }
  0x6f   : > { %1038 = vmatmul.mubr.msk.bf16.gmra.mrb[8].mxu0 %vm367_vm0, %v1151_v11  ;;  %1054 = vmatmul.mubr.msk.bf16.gmra.mrb[8].mxu1 %vm367_vm0, %v1152_v12 }
  0x70   : > { %1041 = vmatprep.mubr.msk.bf16.mxu0 %vm367_vm0, %v1153_v13  ;;  %1057 = vmatprep.mubr.msk.bf16.mxu1 %vm367_vm0, %v1154_v14 }
  0x77   : > { %1042 = vmatmul.mubr.msk.bf16.gmra.mrb[12].mxu0 %vm367_vm0, %v1155_v15  ;;  %1058 = vmatmul.mubr.msk.bf16.gmra.mrb[12].mxu1 %vm367_vm0, %v1156_v16 }
 0x132   : > { %v1031_v18 = vpop.f32.mrb[0].mxu0  ;;  %v1047_v19 = vpop.f32.mrb[0].mxu1 }
 0x133   : > { %v459_v20 = vadd.f32 %v1031_v18, %v1539_v17  ;;  %v523_v21 = vadd.f32 %v1047_v19, %v1539_v17  ;;  %v450_v22 = vpop.f32.mrb[1].mxu0  ;;  %v514_v23 = vpop.f32.mrb[1].mxu1 }
 0x134   : > { %v451_v24 = vadd.f32 %v1539_v17, %v450_v22  ;;  %v515_v25 = vadd.f32 %v1539_v17, %v514_v23  ;;  %v1032_v26 = vpop.f32.mrb[2].mxu0  ;;  %v1048_v27 = vpop.f32.mrb[2].mxu1 }
 0x135   : > { %v579_v28 = vmax.f32 %v459_v20, 0.0  ;;  %v595_v29 = vmax.f32 %v523_v21, 0.0  ;;  %v462_v30 = vadd.f32 %v1032_v26, %v1539_v17  ;;  %v526_v31 = vadd.f32 %v1048_v27, %v1539_v17  ;;  %v453_v32 = vpop.f32.mrb[3].mxu0  ;;  %v517_v33 = vpop.f32.mrb[3].mxu1 }
 0x136   : > { %v577_v34 = vmax.f32 %v451_v24, 0.0  ;;  %v593_v35 = vmax.f32 %v515_v25, 0.0  ;;  %v454_v36 = vadd.f32 %v1539_v17, %v453_v32  ;;  %v518_v37 = vadd.f32 %v1539_v17, %v517_v33 }
 0x137   : > { %v979_v38 = vpack.c.bf16 %v579_v28, %v579_v28  ;;  %v995_v39 = vpack.c.bf16 %v595_v29, %v595_v29  ;;  %v580_v40 = vmax.f32 %v462_v30, 0.0  ;;  %v596_v41 = vmax.f32 %v526_v31, 0.0 }
 0x138   : > { %v977_v42 = vpack.c.bf16 %v577_v34, %v577_v34  ;;  %v993_v43 = vpack.c.bf16 %v593_v35, %v593_v35  ;;  %v578_v44 = vmax.f32 %v454_v36, 0.0  ;;  %v594_v45 = vmax.f32 %v518_v37, 0.0 }
 0x139   : > { %740 = vst.msk [vmem:[%s1551_s24 + $0x8] sm:$0xf] %vm737_vm1, %v979_v38  ;;  %756 = vst.msk [vmem:[%s1551_s24 + $0x48] sm:$0xf] %vm737_vm1, %v995_v39  ;;  %v980_v46 = vpack.c.bf16 %v580_v40, %v580_v40  ;;  %v996_v47 = vpack.c.bf16 %v596_v41, %v596_v41 }
 0x13a   : > { %738 = vst.msk [vmem:[%s1551_s24] sm:$0xf] %vm737_vm1, %v977_v42  ;;  %754 = vst.msk [vmem:[%s1551_s24 + $0x40] sm:$0xf] %vm737_vm1, %v993_v43  ;;  %v978_v48 = vpack.c.bf16 %v578_v44, %v578_v44  ;;  %v994_v49 = vpack.c.bf16 %v594_v45, %v594_v45  ;;  %v1035_v50 = vpop.f32.mrb[4].mxu0  ;;  %v1051_v51 = vpop.f32.mrb[4].mxu1 }
 0x13b   : > { %741 = vst.msk [vmem:[%s1551_s24 + $0xc] sm:$0xf] %vm737_vm1, %v980_v46  ;;  %757 = vst.msk [vmem:[%s1551_s24 + $0x4c] sm:$0xf] %vm737_vm1, %v996_v47  ;;  %v475_v52 = vadd.f32 %v1035_v50, %v1539_v17  ;;  %v539_v53 = vadd.f32 %v1051_v51, %v1539_v17  ;;  %v466_v54 = vpop.f32.mrb[5].mxu0  ;;  %v530_v55 = vpop.f32.mrb[5].mxu1 }
 0x13c   : > { %739 = vst.msk [vmem:[%s1551_s24 + $0x4] sm:$0xf] %vm737_vm1, %v978_v48  ;;  %755 = vst.msk [vmem:[%s1551_s24 + $0x44] sm:$0xf] %vm737_vm1, %v994_v49  ;;  %v467_v56 = vadd.f32 %v1539_v17, %v466_v54  ;;  %v531_v57 = vadd.f32 %v1539_v17, %v530_v55  ;;  %v1036_v58 = vpop.f32.mrb[6].mxu0  ;;  %v1052_v59 = vpop.f32.mrb[6].mxu1 }
 0x13d   : > { %v583_v60 = vmax.f32 %v475_v52, 0.0  ;;  %v599_v61 = vmax.f32 %v539_v53, 0.0  ;;  %v478_v62 = vadd.f32 %v1036_v58, %v1539_v17  ;;  %v542_v63 = vadd.f32 %v1052_v59, %v1539_v17  ;;  %v469_v0 = vpop.f32.mrb[7].mxu0  ;;  %v533_v1 = vpop.f32.mrb[7].mxu1 }
 0x13e   : > { %v581_v2 = vmax.f32 %v467_v56, 0.0  ;;  %v597_v3 = vmax.f32 %v531_v57, 0.0  ;;  %v470_v4 = vadd.f32 %v1539_v17, %v469_v0  ;;  %v534_v5 = vadd.f32 %v1539_v17, %v533_v1 }
 0x13f   : > { %v983_v6 = vpack.c.bf16 %v583_v60, %v583_v60  ;;  %v999_v7 = vpack.c.bf16 %v599_v61, %v599_v61  ;;  %v584_v8 = vmax.f32 %v478_v62, 0.0  ;;  %v600_v9 = vmax.f32 %v542_v63, 0.0 }
 0x140   : > { %v981_v10 = vpack.c.bf16 %v581_v2, %v581_v2  ;;  %v997_v11 = vpack.c.bf16 %v597_v3, %v597_v3  ;;  %v582_v12 = vmax.f32 %v470_v4, 0.0  ;;  %v598_v13 = vmax.f32 %v534_v5, 0.0 }
 0x141   : > { %744 = vst.msk [vmem:[%s1551_s24 + $0x18] sm:$0xf] %vm737_vm1, %v983_v6  ;;  %760 = vst.msk [vmem:[%s1551_s24 + $0x58] sm:$0xf] %vm737_vm1, %v999_v7  ;;  %v984_v14 = vpack.c.bf16 %v584_v8, %v584_v8  ;;  %v1000_v15 = vpack.c.bf16 %v600_v9, %v600_v9 }
 0x142   : > { %742 = vst.msk [vmem:[%s1551_s24 + $0x10] sm:$0xf] %vm737_vm1, %v981_v10  ;;  %758 = vst.msk [vmem:[%s1551_s24 + $0x50] sm:$0xf] %vm737_vm1, %v997_v11  ;;  %v982_v16 = vpack.c.bf16 %v582_v12, %v582_v12  ;;  %v998_v18 = vpack.c.bf16 %v598_v13, %v598_v13  ;;  %v1039_v19 = vpop.f32.mrb[8].mxu0  ;;  %v1055_v20 = vpop.f32.mrb[8].mxu1 }
 0x143   : > { %745 = vst.msk [vmem:[%s1551_s24 + $0x1c] sm:$0xf] %vm737_vm1, %v984_v14  ;;  %761 = vst.msk [vmem:[%s1551_s24 + $0x5c] sm:$0xf] %vm737_vm1, %v1000_v15  ;;  %v491_v21 = vadd.f32 %v1039_v19, %v1539_v17  ;;  %v555_v22 = vadd.f32 %v1055_v20, %v1539_v17  ;;  %v482_v23 = vpop.f32.mrb[9].mxu0  ;;  %v546_v24 = vpop.f32.mrb[9].mxu1 }
 0x144   : > { %743 = vst.msk [vmem:[%s1551_s24 + $0x14] sm:$0xf] %vm737_vm1, %v982_v16  ;;  %759 = vst.msk [vmem:[%s1551_s24 + $0x54] sm:$0xf] %vm737_vm1, %v998_v18  ;;  %v483_v25 = vadd.f32 %v1539_v17, %v482_v23  ;;  %v547_v26 = vadd.f32 %v1539_v17, %v546_v24  ;;  %v1040_v27 = vpop.f32.mrb[10].mxu0  ;;  %v1056_v28 = vpop.f32.mrb[10].mxu1 }
 0x145   : > { %v587_v29 = vmax.f32 %v491_v21, 0.0  ;;  %v603_v30 = vmax.f32 %v555_v22, 0.0  ;;  %v494_v31 = vadd.f32 %v1040_v27, %v1539_v17  ;;  %v558_v32 = vadd.f32 %v1056_v28, %v1539_v17  ;;  %v485_v33 = vpop.f32.mrb[11].mxu0  ;;  %v549_v34 = vpop.f32.mrb[11].mxu1 }
 0x146   : > { %v585_v35 = vmax.f32 %v483_v25, 0.0  ;;  %v601_v36 = vmax.f32 %v547_v26, 0.0  ;;  %v486_v37 = vadd.f32 %v1539_v17, %v485_v33  ;;  %v550_v38 = vadd.f32 %v1539_v17, %v549_v34 }
 0x147   : > { %v987_v39 = vpack.c.bf16 %v587_v29, %v587_v29  ;;  %v1003_v40 = vpack.c.bf16 %v603_v30, %v603_v30  ;;  %v588_v41 = vmax.f32 %v494_v31, 0.0  ;;  %v604_v42 = vmax.f32 %v558_v32, 0.0 }
 0x148   : > { %v985_v43 = vpack.c.bf16 %v585_v35, %v585_v35  ;;  %v1001_v44 = vpack.c.bf16 %v601_v36, %v601_v36  ;;  %v586_v45 = vmax.f32 %v486_v37, 0.0  ;;  %v602_v46 = vmax.f32 %v550_v38, 0.0 }
 0x149   : > { %748 = vst.msk [vmem:[%s1551_s24 + $0x28] sm:$0xf] %vm737_vm1, %v987_v39  ;;  %764 = vst.msk [vmem:[%s1551_s24 + $0x68] sm:$0xf] %vm737_vm1, %v1003_v40  ;;  %v988_v47 = vpack.c.bf16 %v588_v41, %v588_v41  ;;  %v1004_v48 = vpack.c.bf16 %v604_v42, %v604_v42 }
 0x14a   : > { %746 = vst.msk [vmem:[%s1551_s24 + $0x20] sm:$0xf] %vm737_vm1, %v985_v43  ;;  %762 = vst.msk [vmem:[%s1551_s24 + $0x60] sm:$0xf] %vm737_vm1, %v1001_v44  ;;  %v986_v49 = vpack.c.bf16 %v586_v45, %v586_v45  ;;  %v1002_v50 = vpack.c.bf16 %v602_v46, %v602_v46  ;;  %v1043_v51 = vpop.f32.mrb[12].mxu0  ;;  %v1059_v52 = vpop.f32.mrb[12].mxu1 }
 0x14b   : > { %749 = vst.msk [vmem:[%s1551_s24 + $0x2c] sm:$0xf] %vm737_vm1, %v988_v47  ;;  %765 = vst.msk [vmem:[%s1551_s24 + $0x6c] sm:$0xf] %vm737_vm1, %v1004_v48  ;;  %v507_v53 = vadd.f32 %v1043_v51, %v1539_v17  ;;  %v571_v54 = vadd.f32 %v1059_v52, %v1539_v17  ;;  %v498_v55 = vpop.f32.mrb[13].mxu0  ;;  %v562_v56 = vpop.f32.mrb[13].mxu1 }
 0x14c   : > { %747 = vst.msk [vmem:[%s1551_s24 + $0x24] sm:$0xf] %vm737_vm1, %v986_v49  ;;  %763 = vst.msk [vmem:[%s1551_s24 + $0x64] sm:$0xf] %vm737_vm1, %v1002_v50  ;;  %v499_v57 = vadd.f32 %v1539_v17, %v498_v55  ;;  %v563_v58 = vadd.f32 %v1539_v17, %v562_v56  ;;  %v1044_v59 = vpop.f32.mrb[14].mxu0  ;;  %v1060_v60 = vpop.f32.mrb[14].mxu1 }
 0x14d   : > { %v591_v61 = vmax.f32 %v507_v53, 0.0  ;;  %v607_v62 = vmax.f32 %v571_v54, 0.0  ;;  %v510_v63 = vadd.f32 %v1044_v59, %v1539_v17  ;;  %v574_v0 = vadd.f32 %v1060_v60, %v1539_v17  ;;  %v501_v1 = vpop.f32.mrb[15].mxu0  ;;  %v565_v2 = vpop.f32.mrb[15].mxu1 }
 0x14e   : > { %v589_v3 = vmax.f32 %v499_v57, 0.0  ;;  %v605_v4 = vmax.f32 %v563_v58, 0.0  ;;  %v502_v5 = vadd.f32 %v1539_v17, %v501_v1  ;;  %v566_v6 = vadd.f32 %v1539_v17, %v565_v2 }
 0x14f   : > { %v991_v7 = vpack.c.bf16 %v591_v61, %v591_v61  ;;  %v1007_v8 = vpack.c.bf16 %v607_v62, %v607_v62  ;;  %v592_v9 = vmax.f32 %v510_v63, 0.0  ;;  %v608_v10 = vmax.f32 %v574_v0, 0.0 }
 0x150   : > { %v989_v11 = vpack.c.bf16 %v589_v3, %v589_v3  ;;  %v1005_v12 = vpack.c.bf16 %v605_v4, %v605_v4  ;;  %v590_v13 = vmax.f32 %v502_v5, 0.0  ;;  %v606_v14 = vmax.f32 %v566_v6, 0.0 }
 0x151   : > { %752 = vst.msk [vmem:[%s1551_s24 + $0x38] sm:$0xf] %vm737_vm1, %v991_v7  ;;  %768 = vst.msk [vmem:[%s1551_s24 + $0x78] sm:$0xf] %vm737_vm1, %v1007_v8  ;;  %v992_v17 = vpack.c.bf16 %v592_v9, %v592_v9  ;;  %v1008_v15 = vpack.c.bf16 %v608_v10, %v608_v10 }
 0x152   : > { %750 = vst.msk [vmem:[%s1551_s24 + $0x30] sm:$0xf] %vm737_vm1, %v989_v11  ;;  %766 = vst.msk [vmem:[%s1551_s24 + $0x70] sm:$0xf] %vm737_vm1, %v1005_v12  ;;  %v990_v16 = vpack.c.bf16 %v590_v13, %v590_v13  ;;  %v1006_v18 = vpack.c.bf16 %v606_v14, %v606_v14 }
 0x153   : > { %753 = vst.msk [vmem:[%s1551_s24 + $0x3c] sm:$0xf] %vm737_vm1, %v992_v17  ;;  %769 = vst.msk [vmem:[%s1551_s24 + $0x7c] sm:$0xf] %vm737_vm1, %v1008_v15 }
 0x154   : > { %751 = vst.msk [vmem:[%s1551_s24 + $0x34] sm:$0xf] %vm737_vm1, %v990_v16  ;;  %767 = vst.msk [vmem:[%s1551_s24 + $0x74] sm:$0xf] %vm737_vm1, %v1006_v18 }
 0x155   : > { %1228 = shalt.err (!%p1225_p5)
}
 0x156   : > { %s1229_s6 = scalar_lea.hbm %s1634_s18, 2048  ;;  %s1233_s19 = scalar_lea.hbm %s1700_s3, 4096 }
 0x157   : > { %p1230_p9 = scmp.ne.s32.totalorder %s1634_s18, %s1229_s6  ;;  %p1234_p3 = scmp.lt.u32.totalorder %s1634_s18, %s1700_s3 }
 0x158   : > { %p1235_p7 = scmp.lt.u32.totalorder %s1233_s19, %s1229_s6  ;;  %p1237_p4 = scmp.lt.u32.totalorder %s1229_s6, %s1634_s18 }
 0x159   : > { %p1231_p1 = pnand %p1230_p9, %p1429_p10 }
 0x15a   : > { %p1236_p13 = por %p1235_p7, %p1234_p3 }
 0x15b   : > { %p1232_p2 = pneg %p1231_p1 }
 0x15c   : > { %p1238_p6 = por %p1237_p4, %p1236_p13 }
 0x15e   : > { %p1239_p8 = pnand %p1238_p6, %p1232_p2 }
 0x160   : > { %1242 = shalt.err (!%p1239_p8)
}
 0x161   : > { %s1308_s24 = smov 64   ;;  %s1309_s10 = smov 4  }
 0x162   : > { %1069 = dma.vmem_to_hbm [thread:$0]  (%p1429_p10), %s1636_s11, 2048, %s1634_s18, %s771_s25, %s1308_s24, %s1308_s24, %s1309_s10  }
 0x163 PF: > { %s800_s15 = sand.u32 1, %s1281_s12   ;;  %p1718_p12 = scmp.ne.s32.totalorder %s1708_s23, 0 }
 0x164   : > { %p1719_p11 = scmp.ge.s32.totalorder %s1301_s17, 2  ;;  %s801_s9 = scalar_lea.sflag [#allocation4], %s800_s15 }
 0x166   : > { %p1080_p0 = pnand %p1719_p11, %p1718_p12 }
 0x168   : > { %1276 = dma.done.wait (!%p1080_p0), %s801_s9, 2048  }
 0x169   : > { %1278 = vsyncadd (!%p1080_p0), %s801_s9, 4294965248  ;;  %s20_s17 = sadd.s32 1, %s1301_s17   ;;  %s1720_s12 = smov %s1285_s13 }
 0x16a   : > { %p17_p5 = scmp.ge.s32.totalorder %s20_s17, 4   ;;  %s1721_s13 = smov %s1289_s14 }
 0x16b   : > { %s1722_s14 = smov %s1438_s5  ;;  %s1723_s15 = smov %s1297_s16 }
 0x16c   : > { %s1724_s16 = smov %s1726_s28  ;;  %19 = sbr.rel (!%p17_p5) target bundleno = 7 (0x7), region = 85 }
 0x173   :  { %806 = vsyncpa [#allocation3], 1 }
 0x174   :  { %808 = vsyncpa [#allocation3 + $0x1], 1 }
 0x175   :  { %809 = vsyncpa [#allocation6], 1 }
 0x176   :  { %810 = vsyncpa [#allocation4], 1 }
 0x177   :  { %812 = vsyncpa [#allocation4 + $0x1], 1 }

</bundles_post_ra>
